<compile_context>
chip_gen: v5e
topology: v5e:2x2
jax: 0.10.0
libtpu: 0.0.40
codegen_flags: <defaults>
</compile_context>

<pallas_src>
import functools

import jax
import jax.numpy as jnp
from jax import lax
from jax.experimental import pallas as pl
from jax.experimental.pallas import tpu as pltpu

_WIDTH = 128                      # lane width; keeps every store (8,128)-aligned
_TILE_ROWS = 4096                 # (4096, 128) f32 block = 2 MiB per input per step
_VMEM_LIMIT = 48 * 1024 * 1024    # > v5e's 16 MiB default limit, < v7x's 64 MiB phys
_LOG_CLAMP = -100.0


@functools.lru_cache(maxsize=None)
def _num_tensorcores() -> int:
    """2 when a leading 'parallel' grid axis maps onto two TensorCores."""
    try:
        kind = jax.devices()[0].device_kind.lower()
    except Exception:
        return 1
    return 2 if ("v7" in kind or "v4" in kind or "v5p" in kind) else 1


def _bce(x, t, binary_targets):
    """Elementwise BCE matching torch F.binary_cross_entropy (log clamp at -100)."""
    if binary_targets:
        return -jnp.maximum(jnp.log(jnp.where(t > 0.5, x, 1.0 - x)), _LOG_CLAMP)
    log_x = jnp.maximum(jnp.log(x), _LOG_CLAMP)
    log_1mx = jnp.maximum(jnp.log(1.0 - x), _LOG_CLAMP)
    return -(t * log_x + (1.0 - t) * log_1mx)


def _accumulate(acc_ref, k, v, tile_r):
    """acc_ref[0, k] += fold(v); fold uses only vreg adds (no cross-sublane work)."""
    if tile_r % 8 == 0:
        folded = jnp.sum(v.reshape(tile_r // 8, 8, _WIDTH), axis=0)       # (8, 128)
        acc_ref[0, k, :, :] = acc_ref[0, k, :, :] + folded
    else:  # only for a single full-array block with rows not a multiple of 8
        folded = jnp.sum(v, axis=0, keepdims=True)                        # (1, 128)
        acc_ref[0, k, 0:1, :] = acc_ref[0, k, 0:1, :] + folded


def _sums_kernel(x_ref, t_ref, acc_ref, *, bpc, tile_r, rows_valid,
                 needs_mask, binary_targets):
    """Accumulates per-lane partials [sum(t), sum(t*bce), sum((1-t)*bce)]."""
    i = pl.program_id(1)

    @pl.when(i == 0)
    def _():
        acc_ref[...] = jnp.zeros_like(acc_ref)

    x = x_ref[...].astype(jnp.float32)
    t = t_ref[...].astype(jnp.float32)
    bce = _bce(x, t, binary_targets)

    if not needs_mask:
        _accumulate(acc_ref, 0, t, tile_r)
        _accumulate(acc_ref, 1, t * bce, tile_r)
        _accumulate(acc_ref, 2, (1.0 - t) * bce, tile_r)
    else:
        c = pl.program_id(0)
        nvalid = rows_valid - (c * bpc + i) * tile_r     # <= 0 for duplicate steps

        @pl.when(nvalid >= tile_r)                       # full block: no mask cost
        def _():
            _accumulate(acc_ref, 0, t, tile_r)
            _accumulate(acc_ref, 1, t * bce, tile_r)
            _accumulate(acc_ref, 2, (1.0 - t) * bce, tile_r)

        @pl.when(nvalid < tile_r)                        # ragged tail / duplicate step
        def _():
            local_row = lax.broadcasted_iota(jnp.int32, x.shape, 0)
            valid = local_row < nvalid
            zero = jnp.zeros_like(t)
            _accumulate(acc_ref, 0, jnp.where(valid, t, zero), tile_r)
            _accumulate(acc_ref, 1, jnp.where(valid, t * bce, zero), tile_r)
            _accumulate(acc_ref, 2, jnp.where(valid, (1.0 - t) * bce, zero), tile_r)


def _elementwise_kernel(w_ref, x_ref, t_ref, o_ref, *, binary_targets):
    """Elementwise weighted BCE (reduction='none'); neg_w read from SMEM."""
    neg_w = w_ref[0]
    x = x_ref[...].astype(jnp.float32)
    t = t_ref[...].astype(jnp.float32)
    bce = _bce(x, t, binary_targets)
    w = t * (1.0 - neg_w) + (1.0 - t) * neg_w
    o_ref[...] = (w * bce).astype(o_ref.dtype)


@functools.partial(jax.jit, static_argnames=("reduction", "binary_targets"))
def weighted_bce_loss(inputs, targets, reduction="mean", binary_targets=False):
    assert reduction in ("mean", "sum", "none")
    orig_shape = inputs.shape
    n = inputs.size

    # ---- lane-dense (rows, 128) packing; free bitcast whenever n % 128 == 0 ----
    x_flat = inputs.reshape(-1)
    t_flat = targets.reshape(-1)
    pad = (-n) % _WIDTH
    if pad:
        # Fallback only when n is not a multiple of 128: pad < 128 elements with
        # x = t = 1 (bce = 0); the pad count is subtracted from sum(t) below.
        x_flat = jnp.concatenate([x_flat, jnp.ones((pad,), x_flat.dtype)])
        t_flat = jnp.concatenate([t_flat, jnp.ones((pad,), t_flat.dtype)])
    rows = (n + pad) // _WIDTH
    x2 = x_flat.reshape(rows, _WIDTH)     # native dtype; upcast in-kernel
    t2 = t_flat.reshape(rows, _WIDTH)

    tile_r = min(_TILE_ROWS, rows)
    num_blocks = -(-rows // tile_r)

    if reduction in ("mean", "sum"):
        ncores = _num_tensorcores() if num_blocks >= 2 else 1
        bpc = -(-num_blocks // ncores)                  # blocks per core
        needs_mask = (ncores * bpc * tile_r != rows)    # ragged tail / duplicate step

        def in_map(c, i):
            # Clamp so a duplicate trailing step re-reads the last valid block
            # (its contribution is zeroed by the masked branch in-kernel).
            return (jnp.minimum(c * bpc + i, num_blocks - 1), 0)

        partial_sums = pl.pallas_call(
            functools.partial(
                _sums_kernel, bpc=bpc, tile_r=tile_r, rows_valid=rows,
                needs_mask=needs_mask, binary_targets=binary_targets),
            out_shape=jax.ShapeDtypeStruct((ncores, 3, 8, _WIDTH), jnp.float32),
            grid=(ncores, bpc),
            in_specs=[pl.BlockSpec((tile_r, _WIDTH), in_map),
                      pl.BlockSpec((tile_r, _WIDTH), in_map)],
            out_specs=pl.BlockSpec((1, 3, 8, _WIDTH), lambda c, i: (c, 0, 0, 0)),
            compiler_params=pltpu.CompilerParams(
                dimension_semantics=("parallel", "arbitrary"),
                vmem_limit_bytes=_VMEM_LIMIT),
        )(x2, t2)

        sums = jnp.sum(partial_sums, axis=(0, 2, 3))         # (3,)
        s_t, s_pos, s_neg = sums[0], sums[1], sums[2]
        neg_w = (s_t - jnp.float32(pad)) / jnp.float32(n)
        pos_w = 1.0 - neg_w
        total = pos_w * s_pos + neg_w * s_neg
        total = total / jnp.float32(n) if reduction == "mean" else total
        return total.astype(inputs.dtype)

    # --- reduction == 'none': only mean(targets) is needed before the elementwise pass ---
    neg_w_arr = jnp.mean(targets.astype(jnp.float32)).reshape(1)

    out2 = pl.pallas_call(
        functools.partial(_elementwise_kernel, binary_targets=binary_targets),
        out_shape=jax.ShapeDtypeStruct((rows, _WIDTH), inputs.dtype),
        grid=(num_blocks,),
        in_specs=[
            pl.BlockSpec(memory_space=pltpu.MemorySpace.SMEM),        # neg_w scalar
            pl.BlockSpec((tile_r, _WIDTH), lambda i: (i, 0)),
            pl.BlockSpec((tile_r, _WIDTH), lambda i: (i, 0)),
        ],
        out_specs=pl.BlockSpec((tile_r, _WIDTH), lambda i: (i, 0)),
        compiler_params=pltpu.CompilerParams(
            dimension_semantics=("parallel",),
            vmem_limit_bytes=_VMEM_LIMIT),
    )(neg_w_arr, x2, t2)

    if pad:
        return out2.reshape(-1)[:n].reshape(orig_shape)
    return out2.reshape(orig_shape)


class WeightedBCELoss:
    def __init__(self, reduction: str = "mean"):
        assert reduction in ("mean", "sum", "none")
        self.reduction = reduction

    def __call__(self, inputs, targets):
        return weighted_bce_loss(inputs, targets, reduction=self.reduction)


def _reference(inputs, targets, reduction="mean"):
    """Plain-JAX reference mirroring the PyTorch module (for verification)."""
    x = inputs.astype(jnp.float32)
    t = targets.astype(jnp.float32)
    neg_w = jnp.mean(t)
    pos_w = 1.0 - neg_w
    weights = t * pos_w + (1.0 - t) * neg_w
    bce = -(t * jnp.maximum(jnp.log(x), -100.0)
            + (1.0 - t) * jnp.maximum(jnp.log(1.0 - x), -100.0))
    loss = weights * bce
    if reduction == "mean":
        return jnp.mean(loss)
    if reduction == "sum":
        return jnp.sum(loss)
    return loss


if __name__ == "__main__":
    key = jax.random.PRNGKey(0)
    k_x, k_t, k_x2, k_t2, k_x3, k_t3, k_x4, k_t4 = jax.random.split(key, 8)

    # Small NCHW prediction map and binary target map (values in (0,1) / {0,1}).
    shape = (2, 4, 16, 16)
    inputs = jax.nn.sigmoid(jax.random.normal(k_x, shape, dtype=jnp.float32))
    targets = (jax.random.uniform(k_t, shape) > 0.5).astype(jnp.float32)

    loss_fn = WeightedBCELoss(reduction="mean")
    loss = jax.block_until_ready(loss_fn(inputs, targets))
    ref_mean = _reference(inputs, targets, "mean")
    assert jnp.allclose(loss, ref_mean, atol=1e-5, rtol=1e-5), (loss, ref_mean)

    loss_sum = jax.block_until_ready(weighted_bce_loss(inputs, targets, "sum"))
    assert jnp.allclose(loss_sum, _reference(inputs, targets, "sum"),
                        atol=1e-4, rtol=1e-5)

    loss_none = jax.block_until_ready(weighted_bce_loss(inputs, targets, "none"))
    assert loss_none.shape == shape and loss_none.dtype == inputs.dtype
    assert jnp.allclose(loss_none, _reference(inputs, targets, "none"),
                        atol=1e-5, rtol=1e-5)

    # Single-log fast path (exactly equivalent for hard {0,1} targets).
    loss_bin = jax.block_until_ready(
        weighted_bce_loss(inputs, targets, "mean", binary_targets=True))
    assert jnp.allclose(loss_bin, ref_mean, atol=1e-5, rtol=1e-5)

    # n % 128 == 0 with rows not a multiple of 8: zero-copy packing, full-dim block.
    shape2 = (4, 8, 100, 100)
    inputs2 = jax.nn.sigmoid(jax.random.normal(k_x2, shape2, dtype=jnp.float32))
    targets2 = (jax.random.uniform(k_t2, shape2) > 0.3).astype(jnp.float32)
    loss2 = jax.block_until_ready(weighted_bce_loss(inputs2, targets2, "mean"))
    assert jnp.allclose(loss2, _reference(inputs2, targets2, "mean"),
                        atol=1e-4, rtol=1e-4)
    loss2_none = jax.block_until_ready(weighted_bce_loss(inputs2, targets2, "none"))
    assert jnp.allclose(loss2_none, _reference(inputs2, targets2, "none"),
                        atol=1e-5, rtol=1e-5)

    # Multi-block grid with a ragged tail: exercises the pl.when masked branch,
    # partial output-block writeback, and the per-core split on 2-TC chips.
    shape3 = (2, 4, 300, 300)
    inputs3 = jax.nn.sigmoid(jax.random.normal(k_x3, shape3, dtype=jnp.float32))
    targets3 = (jax.random.uniform(k_t3, shape3) > 0.4).astype(jnp.float32)
    loss3 = jax.block_until_ready(weighted_bce_loss(inputs3, targets3, "mean"))
    assert jnp.allclose(loss3, _reference(inputs3, targets3, "mean"),
                        atol=1e-4, rtol=1e-4)
    loss3_none = jax.block_until_ready(weighted_bce_loss(inputs3, targets3, "none"))
    assert jnp.allclose(loss3_none, _reference(inputs3, targets3, "none"),
                        atol=1e-5, rtol=1e-5)

    # n not a multiple of 128: small (<128 elem) pad fallback + host correction.
    shape4 = (2, 3, 17, 19)
    inputs4 = jax.nn.sigmoid(jax.random.normal(k_x4, shape4, dtype=jnp.float32))
    targets4 = (jax.random.uniform(k_t4, shape4) > 0.5).astype(jnp.float32)
    loss4 = jax.block_until_ready(weighted_bce_loss(inputs4, targets4, "mean"))
    assert jnp.allclose(loss4, _reference(inputs4, targets4, "mean"),
                        atol=1e-5, rtol=1e-5)
    loss4_none = jax.block_until_ready(weighted_bce_loss(inputs4, targets4, "none"))
    assert jnp.allclose(loss4_none, _reference(inputs4, targets4, "none"),
                        atol=1e-5, rtol=1e-5)

    # bf16 inputs: reduction='none' output stays bf16 (writeback traffic cut).
    inputs_bf = inputs.astype(jnp.bfloat16)
    targets_bf = targets.astype(jnp.bfloat16)
    none_bf = jax.block_until_ready(weighted_bce_loss(inputs_bf, targets_bf, "none"))
    assert none_bf.dtype == jnp.bfloat16 and none_bf.shape == shape
    assert jnp.allclose(none_bf.astype(jnp.float32),
                        _reference(inputs_bf, targets_bf, "none"),
                        atol=5e-2, rtol=5e-2)

    print("KERNEL_OK")
</pallas_src>

<mosaic_0001>
module attributes {stable_mosaic.version = 11 : i64} {
  func.func @_sums_kernel(%arg0: i32, %arg1: i32, %arg2: memref<16x128xf32, #tpu.memory_space<vmem>>, %arg3: memref<16x128xf32, #tpu.memory_space<vmem>>, %arg4: memref<1x3x8x128xf32, #tpu.memory_space<vmem>>) attributes {dimension_semantics = [#tpu.dimension_semantics<parallel>, #tpu.dimension_semantics<arbitrary>], iteration_bounds = array<i64: 1, 1>, scalar_prefetch = 0 : i64, scratch_operands = 0 : i64, tpu.core_type = #tpu.core_type<tc>, window_params = [{transform_indices = @transform_0, window_bounds = array<i64: 16, 128>}, {transform_indices = @transform_1, window_bounds = array<i64: 16, 128>}, {transform_indices = @transform_2, window_bounds = array<i64: 1, 3, 8, 128>}]} {
    %c0_i32 = arith.constant 0 : i32
    %0 = arith.cmpi eq, %arg1, %c0_i32 : i32
    %1 = arith.extui %0 : i1 to i32
    %c0_i32_0 = arith.constant 0 : i32
    %2 = arith.cmpi ne, %1, %c0_i32_0 : i32
    scf.if %2 {
      %cst_34 = arith.constant 0.000000e+00 : f32
      %48 = vector.broadcast %cst_34 : f32 to vector<1x3x8x128xf32>
      %c0_35 = arith.constant 0 : index
      %c0_36 = arith.constant 0 : index
      %c0_37 = arith.constant 0 : index
      %c0_38 = arith.constant 0 : index
      %49 = vector.load %arg4[%c0_35, %c0_36, %c0_37, %c0_38] : memref<1x3x8x128xf32, #tpu.memory_space<vmem>>, vector<1x3x8x128xf32>
      tpu.vector_store %arg4[%c0_35, %c0_36, %c0_37, %c0_38], %48 {strides = array<i32>} : memref<1x3x8x128xf32, #tpu.memory_space<vmem>>, vector<1x3x8x128xf32>,
    } else {
    }
    %c0 = arith.constant 0 : index
    %c0_1 = arith.constant 0 : index
    %3 = vector.load %arg2[%c0, %c0_1] : memref<16x128xf32, #tpu.memory_space<vmem>>, vector<16x128xf32>
    %c0_2 = arith.constant 0 : index
    %c0_3 = arith.constant 0 : index
    %4 = vector.load %arg3[%c0_2, %c0_3] : memref<16x128xf32, #tpu.memory_space<vmem>>, vector<16x128xf32>
    %5 = math.log %3 : vector<16x128xf32>
    %cst = arith.constant -1.000000e+02 : f32
    %6 = vector.broadcast %cst : f32 to vector<16x128xf32>
    %7 = arith.maximumf %5, %6 : vector<16x128xf32>
    %cst_4 = arith.constant 1.000000e+00 : f32
    %8 = vector.broadcast %cst_4 : f32 to vector<16x128xf32>
    %9 = arith.subf %8, %3 : vector<16x128xf32>
    %10 = math.log %9 : vector<16x128xf32>
    %cst_5 = arith.constant -1.000000e+02 : f32
    %11 = vector.broadcast %cst_5 : f32 to vector<16x128xf32>
    %12 = arith.maximumf %10, %11 : vector<16x128xf32>
    %13 = arith.mulf %4, %7 : vector<16x128xf32>
    %cst_6 = arith.constant 1.000000e+00 : f32
    %14 = vector.broadcast %cst_6 : f32 to vector<16x128xf32>
    %15 = arith.subf %14, %4 : vector<16x128xf32>
    %16 = arith.mulf %15, %12 : vector<16x128xf32>
    %17 = arith.addf %13, %16 : vector<16x128xf32>
    %cst_7 = arith.constant 0.000000e+00 : f32
    %18 = vector.broadcast %cst_7 : f32 to vector<16x128xf32>
    %19 = arith.subf %18, %17 : vector<16x128xf32>
    %20 = vector.shape_cast %4 : vector<16x128xf32> to vector<2x8x128xf32>
    %cst_8 = arith.constant dense<0.000000e+00> : vector<8x128xf32>
    %21 = vector.multi_reduction <add>, %20, %cst_8 [0] : vector<2x8x128xf32> to vector<8x128xf32>
    %c0_9 = arith.constant 0 : index
    %c0_10 = arith.constant 0 : index
    %c0_11 = arith.constant 0 : index
    %c0_12 = arith.constant 0 : index
    %22 = vector.load %arg4[%c0_9, %c0_10, %c0_11, %c0_12] : memref<1x3x8x128xf32, #tpu.memory_space<vmem>>, vector<1x1x8x128xf32>
    %23 = vector.shape_cast %22 : vector<1x1x8x128xf32> to vector<8x128xf32>
    %24 = arith.addf %23, %21 : vector<8x128xf32>
    %c0_13 = arith.constant 0 : index
    %c0_14 = arith.constant 0 : index
    %c0_15 = arith.constant 0 : index
    %c0_16 = arith.constant 0 : index
    %25 = vector.load %arg4[%c0_13, %c0_14, %c0_15, %c0_16] : memref<1x3x8x128xf32, #tpu.memory_space<vmem>>, vector<1x1x8x128xf32>
    %26 = vector.shape_cast %25 : vector<1x1x8x128xf32> to vector<8x128xf32>
    %27 = vector.shape_cast %24 : vector<8x128xf32> to vector<1x1x8x128xf32>
    tpu.vector_store %arg4[%c0_13, %c0_14, %c0_15, %c0_16], %27 {strides = array<i32>} : memref<1x3x8x128xf32, #tpu.memory_space<vmem>>, vector<1x1x8x128xf32>,
    %28 = arith.mulf %4, %19 : vector<16x128xf32>
    %29 = vector.shape_cast %28 : vector<16x128xf32> to vector<2x8x128xf32>
    %cst_17 = arith.constant dense<0.000000e+00> : vector<8x128xf32>
    %30 = vector.multi_reduction <add>, %29, %cst_17 [0] : vector<2x8x128xf32> to vector<8x128xf32>
    %c0_18 = arith.constant 0 : index
    %c1 = arith.constant 1 : index
    %c0_19 = arith.constant 0 : index
    %c0_20 = arith.constant 0 : index
    %31 = vector.load %arg4[%c0_18, %c1, %c0_19, %c0_20] : memref<1x3x8x128xf32, #tpu.memory_space<vmem>>, vector<1x1x8x128xf32>
    %32 = vector.shape_cast %31 : vector<1x1x8x128xf32> to vector<8x128xf32>
    %33 = arith.addf %32, %30 : vector<8x128xf32>
    %c0_21 = arith.constant 0 : index
    %c1_22 = arith.constant 1 : index
    %c0_23 = arith.constant 0 : index
    %c0_24 = arith.constant 0 : index
    %34 = vector.load %arg4[%c0_21, %c1_22, %c0_23, %c0_24] : memref<1x3x8x128xf32, #tpu.memory_space<vmem>>, vector<1x1x8x128xf32>
    %35 = vector.shape_cast %34 : vector<1x1x8x128xf32> to vector<8x128xf32>
    %36 = vector.shape_cast %33 : vector<8x128xf32> to vector<1x1x8x128xf32>
    tpu.vector_store %arg4[%c0_21, %c1_22, %c0_23, %c0_24], %36 {strides = array<i32>} : memref<1x3x8x128xf32, #tpu.memory_space<vmem>>, vector<1x1x8x128xf32>,
    %cst_25 = arith.constant 1.000000e+00 : f32
    %37 = vector.broadcast %cst_25 : f32 to vector<16x128xf32>
    %38 = arith.subf %37, %4 : vector<16x128xf32>
    %39 = arith.mulf %38, %19 : vector<16x128xf32>
    %40 = vector.shape_cast %39 : vector<16x128xf32> to vector<2x8x128xf32>
    %cst_26 = arith.constant dense<0.000000e+00> : vector<8x128xf32>
    %41 = vector.multi_reduction <add>, %40, %cst_26 [0] : vector<2x8x128xf32> to vector<8x128xf32>
    %c0_27 = arith.constant 0 : index
    %c2 = arith.constant 2 : index
    %c0_28 = arith.constant 0 : index
    %c0_29 = arith.constant 0 : index
    %42 = vector.load %arg4[%c0_27, %c2, %c0_28, %c0_29] : memref<1x3x8x128xf32, #tpu.memory_space<vmem>>, vector<1x1x8x128xf32>
    %43 = vector.shape_cast %42 : vector<1x1x8x128xf32> to vector<8x128xf32>
    %44 = arith.addf %43, %41 : vector<8x128xf32>
    %c0_30 = arith.constant 0 : index
    %c2_31 = arith.constant 2 : index
    %c0_32 = arith.constant 0 : index
    %c0_33 = arith.constant 0 : index
    %45 = vector.load %arg4[%c0_30, %c2_31, %c0_32, %c0_33] : memref<1x3x8x128xf32, #tpu.memory_space<vmem>>, vector<1x1x8x128xf32>
    %46 = vector.shape_cast %45 : vector<1x1x8x128xf32> to vector<8x128xf32>
    %47 = vector.shape_cast %44 : vector<8x128xf32> to vector<1x1x8x128xf32>
    tpu.vector_store %arg4[%c0_30, %c2_31, %c0_32, %c0_33], %47 {strides = array<i32>} : memref<1x3x8x128xf32, #tpu.memory_space<vmem>>, vector<1x1x8x128xf32>,
    return
  }
  func.func @transform_0(%arg0: i32, %arg1: i32) -> (i32, i32) {
    %c1_i32 = arith.constant 1 : i32
    %0 = arith.muli %arg0, %c1_i32 : i32
    %1 = arith.addi %0, %arg1 : i32
    %c0_i32 = arith.constant 0 : i32
    %2 = arith.minsi %1, %c0_i32 : i32
    %c0_i32_0 = arith.constant 0 : i32
    %c0_i32_1 = arith.constant 0 : i32
    return %2, %c0_i32_0 : i32, i32
  }
  func.func @transform_1(%arg0: i32, %arg1: i32) -> (i32, i32) {
    %c1_i32 = arith.constant 1 : i32
    %0 = arith.muli %arg0, %c1_i32 : i32
    %1 = arith.addi %0, %arg1 : i32
    %c0_i32 = arith.constant 0 : i32
    %2 = arith.minsi %1, %c0_i32 : i32
    %c0_i32_0 = arith.constant 0 : i32
    %c0_i32_1 = arith.constant 0 : i32
    return %2, %c0_i32_0 : i32, i32
  }
  func.func @transform_2(%arg0: i32, %arg1: i32) -> (i32, i32, i32, i32) {
    %c0_i32 = arith.constant 0 : i32
    %c0_i32_0 = arith.constant 0 : i32
    %c0_i32_1 = arith.constant 0 : i32
    %c0_i32_2 = arith.constant 0 : i32
    return %arg0, %c0_i32, %c0_i32_0, %c0_i32_1 : i32, i32, i32, i32
  }
}

</mosaic_0001>

<bundles_post_ra>
// kernel: weighted_bce_loss.1
= control target key start
LH: loop header
LB: loop body
LE: loop exit
PB: predicated region body
PF: predicated region fallthrough
CT: control target
= control target key end

     0   :  { %s193_s1 = inlined_call_operand.vmem [shape: f32[16,128], index: 1, kind: input, shape index: {}]   ;;  %s194_s0 = inlined_call_operand.vmem [shape: f32[16,128], index: 0, kind: input, shape index: {}]   ;;  %s195_s2 = inlined_call_operand.vmem [shape: f32[1,3,8,128], index: 2, kind: output, shape index: {}]  }
   0x1   :  { %v84_v0 = vld [vmem:[%s193_s1] sm:$0xff]  ;;  %v85_v1 = vld [vmem:[%s193_s1 + $0x8] sm:$0xff] }
   0x2   :  { %v82_v2 = vld [vmem:[%s194_s0] sm:$0xff]  ;;  %v110_v3 = vadd.f32 %v85_v1, %v84_v0  ;;  %v83_v4 = vld [vmem:[%s194_s0 + $0x8] sm:$0xff]  ;;  %v102_v14 = vsub.f32 1.0, %v84_v0  ;;  %v103_v17 = vsub.f32 1.0, %v85_v1 }
   0x3   :  { %149 = vlog2.f32 %v82_v2  ;;  %v92_v5 = vsub.f32 1.0, %v82_v2  ;;  %v93_v6 = vsub.f32 1.0, %v83_v4 }
   0x4   :  { %151 = vlog2.f32 %v83_v4  ;;  %113 = vst [vmem:[%s195_s2] sm:$0xff] %v110_v3 }
   0x5   :  { %153 = vlog2.f32 %v92_v5 }
   0x6   :  { %155 = vlog2.f32 %v93_v6 }
   0x9   :  { %v150_v7 = vpop.eup %149 }
   0xa   :  { %v152_v8 = vpop.eup %151  ;;  %v87_v9 = vmul.f32 0.6931472, %v150_v7 }
   0xb   :  { %v89_v10 = vmul.f32 0.6931472, %v152_v8  ;;  %v154_v11 = vpop.eup %153 }
   0xc   :  { %v90_v12 = vmax.f32 %v87_v9, -100.0  ;;  %v156_v13 = vpop.eup %155  ;;  %v95_v16 = vmul.f32 0.6931472, %v154_v11 }
   0xd   :  { %v91_v15 = vmax.f32 %v89_v10, -100.0  ;;  %v97_v18 = vmul.f32 0.6931472, %v156_v13 }
   0xe   :  { %v98_v19 = vmax.f32 %v95_v16, -100.0  ;;  %v100_v20 = vmul.f32 %v90_v12, %v84_v0 }
   0xf   :  { %v99_v21 = vmax.f32 %v97_v18, -100.0  ;;  %v101_v22 = vmul.f32 %v91_v15, %v85_v1 }
  0x10   :  { %v104_v23 = vmul.f32 %v102_v14, %v98_v19 }
  0x11   :  { %v105_v24 = vmul.f32 %v103_v17, %v99_v21 }
  0x12   :  { %v106_v25 = vadd.f32 %v104_v23, %v100_v20 }
  0x13   :  { %v107_v26 = vadd.f32 %v105_v24, %v101_v22 }
  0x14   :  { %v108_v27 = vsub.f32 0.0, %v106_v25 }
  0x15   :  { %v109_v28 = vsub.f32 0.0, %v107_v26 }
  0x16   :  { %v114_v29 = vmul.f32 %v108_v27, %v84_v0  ;;  %v121_v30 = vmul.f32 %v108_v27, %v102_v14 }
  0x17   :  { %v115_v31 = vmul.f32 %v109_v28, %v85_v1  ;;  %v122_v32 = vmul.f32 %v109_v28, %v103_v17 }
  0x19   :  { %v116_v33 = vadd.f32 %v115_v31, %v114_v29  ;;  %v123_v34 = vadd.f32 %v122_v32, %v121_v30 }
  0x1b   :  { %145 = vst [vmem:[%s195_s2 + $0x8] sm:$0xff] %v116_v33 }
  0x1c   :  { %147 = vst [vmem:[%s195_s2 + $0x10] sm:$0xff] %v123_v34 }

</bundles_post_ra>
